<compile_context>
chip_gen: v5e
topology: v5e:2x2
jax: 0.10.0
libtpu: 0.0.40
codegen_flags: <defaults>
</compile_context>

<pallas_src>
import jax
import jax.numpy as jnp
from jax import lax
from jax.experimental import pallas as pl
from jax.experimental.pallas import tpu as pltpu


def dqn_abstract_kernel(x_ref, w1_ref, b1_ref, w2_ref, b2_ref, w3_ref, b3_ref, out_ref):
    # x_ref: (tile_b, n_obs) f32 -> cast to bf16 in-kernel (hidden under DMA).
    xb = x_ref[...].astype(jnp.bfloat16)

    # Feature-major: (features, tile_b) activations, batch on the lane axis.
    # layer1: (hidden, n_obs) contracted with (tile_b, n_obs) -> (hidden, tile_b)
    h1 = lax.dot_general(w1_ref[...], xb, (((1,), (1,)), ((), ())),
                         preferred_element_type=jnp.float32) + b1_ref[...]
    h1 = jnp.maximum(h1, 0.0).astype(jnp.bfloat16)

    # layer2: (hidden, hidden) @ (hidden, tile_b) -> (hidden, tile_b)
    h2 = jnp.dot(w2_ref[...], h1, preferred_element_type=jnp.float32) + b2_ref[...]
    h2 = jnp.maximum(h2, 0.0).astype(jnp.bfloat16)

    # layer3_abs: (n_abs, hidden) @ (hidden, tile_b) -> (n_abs, tile_b)
    logits = jnp.dot(w3_ref[...], h2, preferred_element_type=jnp.float32) + b3_ref[...]

    # softmax over the abstract-action axis (axis 0 = sublanes; XLU reduce),
    # max-stabilized. Exact normalization so row sums are exactly 1 (f32).
    m = jnp.max(logits, axis=0, keepdims=True)
    e = jnp.exp(logits - m)
    denom = jnp.sum(e, axis=0, keepdims=True)
    # Dense, unmasked (n_abs, tile_b) store: batch fills the 128 lanes.
    out_ref[...] = e / denom


def _round_up(v, m):
    return ((v + m - 1) // m) * m


def dqn_abstract_forward(x, params, tile_b_cap=2048):
    """Forward pass. x: [B, n_observations] f32; params from pack_params.
    Returns [B, n_abs] f32 probabilities."""
    w1, b1, w2, b2, w3, b3 = params            # w*: bf16 [out, in]; b*: f32 [out, 1]
    B, n_obs = x.shape
    hidden = w1.shape[0]
    n_abs = w3.shape[0]

    # --- batch tiling: few large tiles, minimal padding, >=2 tiles for big B ---
    n_tiles = pl.cdiv(B, tile_b_cap)
    if n_tiles < 2 and B >= 1024:
        n_tiles = 2                            # let v7x megacore shard the batch axis
    # Batch rides the lane axis of the output block -> tiles must be a multiple
    # of 128 when multi-tile; a single (full) tile only needs sublane granularity.
    gran = 8 if n_tiles == 1 else 128
    tile_b = _round_up(pl.cdiv(B, n_tiles), gran)
    b_pad = n_tiles * tile_b
    if b_pad != B:
        x = jnp.pad(x, ((0, b_pad - B), (0, 0)))

    def resident(shape):
        # Same block index every grid step -> weight/bias stays VMEM-resident.
        return pl.BlockSpec(shape, lambda i, _s=len(shape): (0,) * _s)

    flops = 2 * b_pad * (n_obs * hidden + hidden * hidden + hidden * n_abs)
    transcendentals = b_pad * n_abs            # exp per logit
    bytes_accessed = (
        b_pad * n_obs * 4
        + (w1.size + w2.size + w3.size) * 2
        + (b1.size + b2.size + b3.size) * 4
        + b_pad * n_abs * 4
    )

    out_t = pl.pallas_call(
        dqn_abstract_kernel,
        out_shape=jax.ShapeDtypeStruct((n_abs, b_pad), jnp.float32),
        grid=(n_tiles,),
        in_specs=[
            pl.BlockSpec((tile_b, n_obs), lambda i: (i, 0)),
            resident(w1.shape), resident(b1.shape),
            resident(w2.shape), resident(b2.shape),
            resident(w3.shape), resident(b3.shape),
        ],
        out_specs=pl.BlockSpec((n_abs, tile_b), lambda i: (0, i)),
        compiler_params=pltpu.CompilerParams(
            dimension_semantics=("parallel",)),
        cost_estimate=pl.CostEstimate(
            flops=flops,
            transcendentals=transcendentals,
            bytes_accessed=bytes_accessed),
    )(x, w1, b1, w2, b2, w3, b3)

    # Tiny [n_abs, B] -> [B, n_abs] transpose back to batch-major.
    return out_t[:, :B].T


def init_params(key, n_observations, n_abs_actions, hidden_size):
    """f32 master params in PyTorch nn.Linear layout: weight [out, in], bias [out].
    Init mimics nn.Linear's uniform(-1/sqrt(fan_in), 1/sqrt(fan_in))."""
    def linear(k, fan_in, fan_out):
        kw, kb = jax.random.split(k)
        bound = 1.0 / jnp.sqrt(jnp.float32(fan_in))
        w = jax.random.uniform(kw, (fan_out, fan_in), jnp.float32, -bound, bound)
        b = jax.random.uniform(kb, (fan_out,), jnp.float32, -bound, bound)
        return w, b

    k1, k2, k3 = jax.random.split(key, 3)
    w1, b1 = linear(k1, n_observations, hidden_size)
    w2, b2 = linear(k2, hidden_size, hidden_size)
    w3, b3 = linear(k3, hidden_size, n_abs_actions)
    return (w1, b1, w2, b2, w3, b3)


def pack_params(params_f32):
    """One-time packing for the kernel: bf16 weights [out, in], f32 biases [out, 1]."""
    w1, b1, w2, b2, w3, b3 = params_f32
    return (w1.astype(jnp.bfloat16), b1.reshape(-1, 1).astype(jnp.float32),
            w2.astype(jnp.bfloat16), b2.reshape(-1, 1).astype(jnp.float32),
            w3.astype(jnp.bfloat16), b3.reshape(-1, 1).astype(jnp.float32))


def reference_forward_f32(x, params_f32):
    """Pure-f32 reference (matches the PyTorch module semantics)."""
    w1, b1, w2, b2, w3, b3 = params_f32
    h1 = jax.nn.relu(x @ w1.T + b1)
    h2 = jax.nn.relu(h1 @ w2.T + b2)
    logits = h2 @ w3.T + b3
    return jax.nn.softmax(logits, axis=1)


def reference_forward_bf16(x, params_f32):
    """Precision-matched reference (bf16 matmul inputs, f32 accum/softmax)."""
    w1, b1, w2, b2, w3, b3 = params_f32
    xb = x.astype(jnp.bfloat16)
    h1 = jnp.dot(xb, w1.astype(jnp.bfloat16).T, preferred_element_type=jnp.float32) + b1
    h1 = jnp.maximum(h1, 0.0).astype(jnp.bfloat16)
    h2 = jnp.dot(h1, w2.astype(jnp.bfloat16).T, preferred_element_type=jnp.float32) + b2
    h2 = jnp.maximum(h2, 0.0).astype(jnp.bfloat16)
    logits = jnp.dot(h2, w3.astype(jnp.bfloat16).T, preferred_element_type=jnp.float32) + b3
    return jax.nn.softmax(logits, axis=1)


if __name__ == "__main__":
    n_observations = 16
    n_abs_actions = 8
    hidden_size = 32  # DQN_HIDDEN_SIZE

    key = jax.random.PRNGKey(0)
    kx, kp, kx2 = jax.random.split(key, 3)
    params_f32 = init_params(kp, n_observations, n_abs_actions, hidden_size)
    params = pack_params(params_f32)   # done once, outside the forward path

    # --- small-batch check (B=2, single tile) ---
    B = 2
    x = jax.random.normal(kx, (B, n_observations), jnp.float32)
    out = jax.block_until_ready(dqn_abstract_forward(x, params))
    assert out.shape == (B, n_abs_actions)

    ref_bf16 = reference_forward_bf16(x, params_f32)
    ref_f32 = reference_forward_f32(x, params_f32)
    assert jnp.allclose(out, ref_bf16, atol=2e-3, rtol=2e-3)   # matches kernel precision
    assert jnp.allclose(out, ref_f32, atol=1e-2, rtol=1e-2)    # close to f32 module
    assert jnp.allclose(jnp.sum(out, axis=1), 1.0, atol=1e-3)  # exact normalization now

    # --- multi-tile check (forces a 3-step grid + padding path) ---
    B2 = 300
    x2 = jax.random.normal(kx2, (B2, n_observations), jnp.float32)
    out2 = jax.block_until_ready(dqn_abstract_forward(x2, params, tile_b_cap=128))
    assert out2.shape == (B2, n_abs_actions)
    ref2 = reference_forward_bf16(x2, params_f32)
    assert jnp.allclose(out2, ref2, atol=2e-3, rtol=2e-3)
    assert jnp.allclose(jnp.sum(out2, axis=1), 1.0, atol=1e-3)

    print("KERNEL_OK")
</pallas_src>

<mosaic_0001>
module attributes {stable_mosaic.version = 11 : i64} {
  func.func @dqn_abstract_kernel(%arg0: i32, %arg1: memref<8x16xf32, #tpu.memory_space<vmem>>, %arg2: memref<32x16xbf16, #tpu.memory_space<vmem>>, %arg3: memref<32x1xf32, #tpu.memory_space<vmem>>, %arg4: memref<32x32xbf16, #tpu.memory_space<vmem>>, %arg5: memref<32x1xf32, #tpu.memory_space<vmem>>, %arg6: memref<8x32xbf16, #tpu.memory_space<vmem>>, %arg7: memref<8x1xf32, #tpu.memory_space<vmem>>, %arg8: memref<8x8xf32, #tpu.memory_space<vmem>>) attributes {dimension_semantics = [#tpu.dimension_semantics<parallel>], iteration_bounds = array<i64: 1>, scalar_prefetch = 0 : i64, scratch_operands = 0 : i64, tpu.core_type = #tpu.core_type<tc>, window_params = [{transform_indices = @transform_0, window_bounds = array<i64: 8, 16>}, {pipeline_mode = #tpu.pipeline_mode<synchronous>, transform_indices = @transform_1, window_bounds = array<i64: 32, 16>}, {pipeline_mode = #tpu.pipeline_mode<synchronous>, transform_indices = @transform_2, window_bounds = array<i64: 32, 1>}, {pipeline_mode = #tpu.pipeline_mode<synchronous>, transform_indices = @transform_3, window_bounds = array<i64: 32, 32>}, {pipeline_mode = #tpu.pipeline_mode<synchronous>, transform_indices = @transform_4, window_bounds = array<i64: 32, 1>}, {pipeline_mode = #tpu.pipeline_mode<synchronous>, transform_indices = @transform_5, window_bounds = array<i64: 8, 32>}, {pipeline_mode = #tpu.pipeline_mode<synchronous>, transform_indices = @transform_6, window_bounds = array<i64: 8, 1>}, {transform_indices = @transform_7, window_bounds = array<i64: 8, 8>}]} {
    %c0 = arith.constant 0 : index
    %c0_0 = arith.constant 0 : index
    %0 = vector.load %arg1[%c0, %c0_0] : memref<8x16xf32, #tpu.memory_space<vmem>>, vector<8x16xf32>
    %1 = arith.truncf %0 : vector<8x16xf32> to vector<8x16xbf16>
    %c0_1 = arith.constant 0 : index
    %c0_2 = arith.constant 0 : index
    %2 = vector.load %arg2[%c0_1, %c0_2] : memref<32x16xbf16, #tpu.memory_space<vmem>>, vector<32x16xbf16>
    %cst = arith.constant dense<0.000000e+00> : vector<32x8xf32>
    %3 = tpu.matmul %2, %1, %cst {dimension_numbers = #tpu.dot_dimension_numbers<[1], [1], [0], [0], [0, 0, 1, 0], [], []>} : vector<32x16xbf16>, vector<8x16xbf16>, vector<32x8xf32> -> vector<32x8xf32>
    %c0_3 = arith.constant 0 : index
    %c0_4 = arith.constant 0 : index
    %4 = vector.load %arg3[%c0_3, %c0_4] : memref<32x1xf32, #tpu.memory_space<vmem>>, vector<32x1xf32>
    %5 = vector.broadcast %4 : vector<32x1xf32> to vector<32x8xf32>
    %6 = arith.addf %3, %5 : vector<32x8xf32>
    %cst_5 = arith.constant 0.000000e+00 : f32
    %7 = vector.broadcast %cst_5 : f32 to vector<32x8xf32>
    %8 = arith.maximumf %6, %7 : vector<32x8xf32>
    %9 = arith.truncf %8 : vector<32x8xf32> to vector<32x8xbf16>
    %c0_6 = arith.constant 0 : index
    %c0_7 = arith.constant 0 : index
    %10 = vector.load %arg4[%c0_6, %c0_7] : memref<32x32xbf16, #tpu.memory_space<vmem>>, vector<32x32xbf16>
    %cst_8 = arith.constant dense<0.000000e+00> : vector<32x8xf32>
    %11 = tpu.matmul %10, %9, %cst_8 {dimension_numbers = #tpu.dot_dimension_numbers<[1], [0], [0], [1], [0, 0, 1, 1], [], []>} : vector<32x32xbf16>, vector<32x8xbf16>, vector<32x8xf32> -> vector<32x8xf32>
    %c0_9 = arith.constant 0 : index
    %c0_10 = arith.constant 0 : index
    %12 = vector.load %arg5[%c0_9, %c0_10] : memref<32x1xf32, #tpu.memory_space<vmem>>, vector<32x1xf32>
    %13 = vector.broadcast %12 : vector<32x1xf32> to vector<32x8xf32>
    %14 = arith.addf %11, %13 : vector<32x8xf32>
    %cst_11 = arith.constant 0.000000e+00 : f32
    %15 = vector.broadcast %cst_11 : f32 to vector<32x8xf32>
    %16 = arith.maximumf %14, %15 : vector<32x8xf32>
    %17 = arith.truncf %16 : vector<32x8xf32> to vector<32x8xbf16>
    %c0_12 = arith.constant 0 : index
    %c0_13 = arith.constant 0 : index
    %18 = vector.load %arg6[%c0_12, %c0_13] : memref<8x32xbf16, #tpu.memory_space<vmem>>, vector<8x32xbf16>
    %cst_14 = arith.constant dense<0.000000e+00> : vector<8x8xf32>
    %19 = tpu.matmul %18, %17, %cst_14 {dimension_numbers = #tpu.dot_dimension_numbers<[1], [0], [0], [1], [0, 0, 1, 1], [], []>} : vector<8x32xbf16>, vector<32x8xbf16>, vector<8x8xf32> -> vector<8x8xf32>
    %c0_15 = arith.constant 0 : index
    %c0_16 = arith.constant 0 : index
    %20 = vector.load %arg7[%c0_15, %c0_16] : memref<8x1xf32, #tpu.memory_space<vmem>>, vector<8x1xf32>
    %21 = vector.broadcast %20 : vector<8x1xf32> to vector<8x8xf32>
    %22 = arith.addf %19, %21 : vector<8x8xf32>
    %cst_17 = arith.constant dense<0xFF800000> : vector<8xf32>
    %23 = vector.multi_reduction <maximumf>, %22, %cst_17 [0] : vector<8x8xf32> to vector<8xf32>
    %24 = vector.shape_cast %23 : vector<8xf32> to vector<1x8xf32>
    %25 = vector.broadcast %24 : vector<1x8xf32> to vector<8x8xf32>
    %26 = arith.subf %22, %25 : vector<8x8xf32>
    %27 = math.exp %26 : vector<8x8xf32>
    %cst_18 = arith.constant dense<0.000000e+00> : vector<8xf32>
    %28 = vector.multi_reduction <add>, %27, %cst_18 [0] : vector<8x8xf32> to vector<8xf32>
    %29 = vector.shape_cast %28 : vector<8xf32> to vector<1x8xf32>
    %30 = vector.broadcast %29 : vector<1x8xf32> to vector<8x8xf32>
    %31 = arith.divf %27, %30 : vector<8x8xf32>
    %c0_19 = arith.constant 0 : index
    %c0_20 = arith.constant 0 : index
    %32 = vector.load %arg8[%c0_19, %c0_20] : memref<8x8xf32, #tpu.memory_space<vmem>>, vector<8x8xf32>
    tpu.vector_store %arg8[%c0_19, %c0_20], %31 {strides = array<i32>} : memref<8x8xf32, #tpu.memory_space<vmem>>, vector<8x8xf32>,
    return
  }
  func.func @transform_0(%arg0: i32) -> (i32, i32) {
    %c0_i32 = arith.constant 0 : i32
    %c0_i32_0 = arith.constant 0 : i32
    return %arg0, %c0_i32 : i32, i32
  }
  func.func @transform_1(%arg0: i32) -> (i32, i32) {
    %c0_i32 = arith.constant 0 : i32
    %c0_i32_0 = arith.constant 0 : i32
    %c0_i32_1 = arith.constant 0 : i32
    return %c0_i32, %c0_i32_0 : i32, i32
  }
  func.func @transform_2(%arg0: i32) -> (i32, i32) {
    %c0_i32 = arith.constant 0 : i32
    %c0_i32_0 = arith.constant 0 : i32
    %c0_i32_1 = arith.constant 0 : i32
    return %c0_i32, %c0_i32_0 : i32, i32
  }
  func.func @transform_3(%arg0: i32) -> (i32, i32) {
    %c0_i32 = arith.constant 0 : i32
    %c0_i32_0 = arith.constant 0 : i32
    %c0_i32_1 = arith.constant 0 : i32
    return %c0_i32, %c0_i32_0 : i32, i32
  }
  func.func @transform_4(%arg0: i32) -> (i32, i32) {
    %c0_i32 = arith.constant 0 : i32
    %c0_i32_0 = arith.constant 0 : i32
    %c0_i32_1 = arith.constant 0 : i32
    return %c0_i32, %c0_i32_0 : i32, i32
  }
  func.func @transform_5(%arg0: i32) -> (i32, i32) {
    %c0_i32 = arith.constant 0 : i32
    %c0_i32_0 = arith.constant 0 : i32
    %c0_i32_1 = arith.constant 0 : i32
    return %c0_i32, %c0_i32_0 : i32, i32
  }
  func.func @transform_6(%arg0: i32) -> (i32, i32) {
    %c0_i32 = arith.constant 0 : i32
    %c0_i32_0 = arith.constant 0 : i32
    %c0_i32_1 = arith.constant 0 : i32
    return %c0_i32, %c0_i32_0 : i32, i32
  }
  func.func @transform_7(%arg0: i32) -> (i32, i32) {
    %c0_i32 = arith.constant 0 : i32
    %c0_i32_0 = arith.constant 0 : i32
    return %c0_i32, %arg0 : i32, i32
  }
}

</mosaic_0001>

<bundles_post_ra>
// kernel: tpu_custom_call.1
= control target key start
LH: loop header
LB: loop body
LE: loop exit
PB: predicated region body
PF: predicated region fallthrough
CT: control target
= control target key end

     0   :  { %vm68_vm0 = vcmask 130048   ;;  %v307_v3 = vmov 0   ;;  %s406_s0 = inlined_call_operand.vmem [shape: f32[8,16], index: 0, kind: input, shape index: {}]   ;;  %s407_s1 = inlined_call_operand.vmem [shape: bf16[32,16], index: 1, kind: input, shape index: {}]   ;;  %s408_s2 = inlined_call_operand.vmem [shape: f32[32,1], index: 2, kind: input, shape index: {}]   ;;  %s409_s3 = inlined_call_operand.vmem [shape: bf16[32,32], index: 3, kind: input, shape index: {}]   ;;  %s410_s4 = inlined_call_operand.vmem [shape: f32[32,1], index: 4, kind: input, shape index: {}]   ;;  %s411_s5 = inlined_call_operand.vmem [shape: bf16[8,32], index: 5, kind: input, shape index: {}]   ;;  %s412_s6 = inlined_call_operand.vmem [shape: f32[8,1], index: 6, kind: input, shape index: {}]   ;;  %s413_s7 = inlined_call_operand.hbm [shape: f32[8,8], index: 7, kind: output, shape index: {}]  }
   0x1   :  { %v28_v0 = vld [vmem:[%s406_s0] sm:$0xff]  ;;  %v36_v1 = vld [vmem:[%s408_s2 + $0x10] sm:$0xff]  ;;  %274 = vset.pattern.permute.xlu0 %v307_v3  ;;  %275 = vset.pattern.permute.xlu1 %v307_v3 }
   0x2   :  { %v29_v2 = vpack.c.bf16 %v28_v0, %v28_v0  ;;  %v34_v4 = vld [vmem:[%s408_s2] sm:$0xff]  ;;  %50 = vperm.xlu0 %274, %v36_v1   ;;  %276 = vset.pattern.permute.xlu2 %v307_v3 }
   0x3   :  { %40 = vperm.xlu1 %275, %v34_v4  }
   0x4   :  { %v76_v5 = vsel %vm68_vm0, %v29_v2, 0 }
   0x5   :  { %12 = vsyncpa [#allocation3], 0  ;;  %271 = vmatpush.bf16.xpose.msra.mxu3 %v76_v5  ;;  %85 = vmatpush.bf16.xpose.msra.mxu0 %v76_v5  ;;  %v268_v6 = vld [vmem:[%s407_s1 + $0x8] sm:$0xff]  ;;  %v267_v7 = vld [vmem:[%s407_s1] sm:$0xff]  ;;  %vm141_vm1 = vcmask 261120   ;;  %vm196_vm2 = vcmask 64512  }
   0x6   :  { %v37_v8 = vld [vmem:[%s408_s2 + $0x18] sm:$0xff]  ;;  %v35_v9 = vld [vmem:[%s408_s2 + $0x8] sm:$0xff]  ;;  %v107_v10 = vld [vmem:[%s410_s4] sm:$0xff]  ;;  %s237_s28 = sshll.u32 %s413_s7, 4  ;;  %s238_s28 = int_to_ptr.hbm [resolvable:$true] %s237_s28 }
   0x7   :  { %v108_v11 = vld [vmem:[%s410_s4 + $0x8] sm:$0xff]  ;;  %v109_v17 = vld [vmem:[%s410_s4 + $0x10] sm:$0xff]  ;;  %v110_v27 = vld [vmem:[%s410_s4 + $0x18] sm:$0xff] }
   0x8   :  { %123 = vperm.xlu2 %276, %v109_v17   ;;  %v269_v32 = vld [vmem:[%s409_s3] sm:$0xff]  ;;  %v270_v34 = vld [vmem:[%s409_s3 + $0x8] sm:$0xff] }
   0x9   :  { %v174_v33 = vld [vmem:[%s412_s6] sm:$0xff] }
   0xa   :  { %55 = vperm.xlu0 %274, %v37_v8   ;;  %v173_v53 = vld [vmem:[%s411_s5] sm:$0xf]  ;;  %s308_s5 = smov [#allocation2]  }
   0xb   :  { %45 = vperm.xlu1 %275, %v35_v9   ;;  %s235_s25 = sshll.u32 %s308_s5, 4  ;;  %s236_s25 = int_to_ptr.vmem [resolvable:$true] %s235_s25 }
   0xc   :  { %255 = vmatmul.msk.bf16.vlgmr.msra.gmra.mxu3 %vm68_vm0, %v268_v6  ;;  %254 = vmatmul.msk.bf16.vlgmr.msra.gmra.mxu0 %vm68_vm0, %v267_v7 }
  0x10   :  { %128 = vperm.xlu2 %276, %v110_v27  }
  0x12   :  { %113 = vperm.xlu0 %274, %v107_v10  }
  0x13   :  { %118 = vperm.xlu1 %275, %v108_v11  }
  0x18   :  { %177 = vperm.xlu2 %276, %v174_v33  }
  0x62   :  { %v124_v37 = vpop.permute.xlu2 %123 }
  0x6a   :  { %v129_v41 = vpop.permute.xlu2 %128 }
  0x72   :  { %v178_v54 = vpop.permute.xlu2 %177 }
  0x74   :  { %v51_v13 = vpop.permute.xlu0 %50 }
  0x75   :  { %v41_v14 = vpop.permute.xlu1 %40 }
  0x7c   :  { %v56_v18 = vpop.permute.xlu0 %55 }
  0x7d   :  { %v46_v20 = vpop.permute.xlu1 %45 }
  0x84   :  { %v114_v45 = vpop.permute.xlu0 %113 }
  0x85   :  { %v119_v39 = vpop.permute.xlu1 %118 }
  0x89   :  { %v87_v12 = vpop.f32.mrf.mxu0 }
  0x8a   :  { %v88_v22 = vadd.f32 %v87_v12, %v41_v14 }
  0x8c   :  { %v97_v28 = vmax.f32 %v88_v22, 0.0 }
  0x8f   :  { %v92_v15 = vpop.f32.mrf.mxu3 }
  0x90   :  { %v93_v19 = vadd.f32 %v92_v15, %v51_v13 }
  0x91   :  { %v89_v16 = vpop.f32.mrf.mxu0 }
  0x92   :  { %v90_v23 = vadd.f32 %v89_v16, %v46_v20  ;;  %v99_v25 = vmax.f32 %v93_v19, 0.0 }
  0x94   :  { %v98_v29 = vmax.f32 %v90_v23, 0.0 }
  0x96   :  { %v101_v31 = vpack.c.bf16 %v98_v29, %v97_v28 }
  0x97   :  { %v94_v21 = vpop.f32.mrf.mxu3 }
  0x98   :  { %v95_v24 = vadd.f32 %v94_v21, %v56_v18 }
  0x9a   :  { %v100_v26 = vmax.f32 %v95_v24, 0.0 }
  0x9c   :  { %v102_v30 = vpack.c.bf16 %v100_v26, %v99_v25 }
  0x9e   :  { %154 = vmatpush.bf16.msra.mxu1 %v102_v30 }
  0xa2   :  { %155 = vmatpush.bf16.msra.mxu1 %v101_v31 }
  0xa5   :  { %264 = vmatmul.msk.bf16.vlgmr.msra.gmra.mxu1 %vm141_vm1, %v269_v32 }
  0xb5   :  { %265 = vmatmul.msk.bf16.gmra.mxu1 %vm141_vm1, %v270_v34 }
 0x122   :  { %v157_v35 = vpop.f32.mrf.mxu1 }
 0x123   :  { %v158_v46 = vadd.f32 %v157_v35, %v114_v45 }
 0x125   :  { %v167_v51 = vmax.f32 %v158_v46, 0.0 }
 0x12a   :  { %v159_v36 = vpop.f32.mrf.mxu1 }
 0x12b   :  { %v160_v43 = vadd.f32 %v159_v36, %v119_v39 }
 0x12d   :  { %v168_v49 = vmax.f32 %v160_v43, 0.0 }
 0x12f   :  { %v171_v52 = vpack.c.bf16 %v168_v49, %v167_v51 }
 0x132   :  { %v162_v38 = vpop.f32.mrf.mxu1 }
 0x133   :  { %v163_v40 = vadd.f32 %v162_v38, %v124_v37 }
 0x135   :  { %v169_v47 = vmax.f32 %v163_v40, 0.0 }
 0x13a   :  { %v164_v42 = vpop.f32.mrf.mxu1 }
 0x13b   :  { %v165_v44 = vadd.f32 %v164_v42, %v129_v41 }
 0x13d   :  { %v170_v48 = vmax.f32 %v165_v44, 0.0 }
 0x13f   :  { %v172_v50 = vpack.c.bf16 %v170_v48, %v169_v47 }
 0x141   :  { %189 = vmatpush.bf16.msra.mxu2 %v172_v50 }
 0x145   :  { %190 = vmatpush.bf16.msra.mxu2 %v171_v52 }
 0x148   :  { %266 = vmatmul.msk.bf16.vlgmr.msra.gmra.mxu2 %vm141_vm1, %v173_v53 }
 0x1cb   :  { %v192_v55 = vpop.f32.mrf.mxu2 }
 0x1cc   :  { %v193_v56 = vadd.f32 %v192_v55, %v178_v54 }
 0x1ce   :  { %v197_v57 = vsel %vm196_vm2, %v193_v56, -inf }
 0x1cf   :  { %v198_v58 = vrot.slane %v197_v57, 4 }
 0x1d1   :  { %v199_v59 = vmax.f32 %v197_v57, %v198_v58 }
 0x1d3   :  { %v200_v60 = vrot.slane %v199_v59, 2  ;;  %v194_v61 = vpop.f32.mrf.mxu2 }
 0x1d5   :  { %v201_v62 = vmax.f32 %v199_v59, %v200_v60 }
 0x1d7   :  { %v202_v63 = vrot.slane %v201_v62, 1 }
 0x1d9   :  { %v203_v0 = vmax.f32 %v201_v62, %v202_v63 }
 0x1db   :  { %v204_v1 = vsub.f32 %v193_v56, %v203_v0 }
 0x1dd   :  { %v205_v2 = vmul.f32 1.442695, %v204_v1 }
 0x1df   :  { %277 = vpow2.f32 %v205_v2 }
 0x1e5   :  { %v278_v3 = vpop.eup %277 }
 0x1e6   :  { %v207_v4 = vsel %vm196_vm2, %v278_v3, 0.0 }
 0x1e7   :  { %v208_v5 = vrot.slane %v207_v4, 4 }
 0x1e9   :  { %v209_v6 = vadd.f32 %v208_v5, %v207_v4 }
 0x1eb   :  { %v210_v7 = vrot.slane %v209_v6, 2 }
 0x1ed   :  { %v211_v8 = vadd.f32 %v210_v7, %v209_v6 }
 0x1ef   :  { %v212_v9 = vrot.slane %v211_v8, 1 }
 0x1f1   :  { %v213_v10 = vadd.f32 %v212_v9, %v211_v8 }
 0x1f3   :  { %279 = vrcp.f32 %v213_v10  ;;  %v225_v14 = vand.u32 2147483648, %v213_v10  ;;  %v223_v16 = vand.u32 2147483647, %v213_v10  ;;  %vm219_vm4 = vweird.f32 %v213_v10 }
 0x1f5   :  { %v226_v18 = vor.u32 1.1754944e-38, %v225_v14  ;;  %vm224_vm6 = vcmp.eq.f32.partialorder %v223_v16, 8.507059e+37 }
 0x1f9   :  { %v280_v11 = vpop.eup %279 }
 0x1fa   :  { %v215_v12 = vmul.f32 %v280_v11, %v213_v10  ;;  %vm220_vm3 = vweird.f32 %v280_v11 }
 0x1fb   :  { %vm221_vm5 = vmor %vm219_vm4, %vm220_vm3 }
 0x1fc   :  { %v216_v13 = vsub.f32 1.0, %v215_v12 }
 0x1fe   :  { %v217_v15 = vmul.f32 %v280_v11, %v216_v13 }
 0x200   :  { %v218_v17 = vadd.f32 %v280_v11, %v217_v15 }
 0x202   :  { %v222_v19 = vsel %vm221_vm5, %v280_v11, %v218_v17 }
 0x203   :  { %v227_v20 = vsel %vm224_vm6, %v226_v18, %v222_v19 }
 0x204   :  { %v228_v21 = vmul.f32 %v278_v3, %v227_v20 }
 0x206   :  { %229 = vst.msk [vmem:[#allocation2] sm:$0xff] %vm196_vm2, %v228_v21 }
 0x207   :  { %240 = dma.vmem_to_hbm [thread:$0]  %s236_s25, 128, %s238_s28, [#allocation3]  }
 0x208   :  { %305 = dma.done.wait [#allocation3], 128  }
 0x209   :  { %306 = vsyncadd [#allocation3], 4294967168 }
 0x20a   :  { %245 = vsyncpa [#allocation3], 1 }

</bundles_post_ra>
